<compile_context>
chip_gen: v6e
topology: v6e:2x2x1
jax: 0.10.0
libtpu: 0.0.40
codegen_flags: <defaults>
</compile_context>

<pallas_src>
import math

import jax
import jax.numpy as jnp
from jax.experimental import pallas as pl
from jax.experimental.pallas import tpu as pltpu

LANES = 128       # packed output row width (lane-dense, unmasked stores)
TILE_ROWS = 8192  # packed rows per grid step -> 4 MiB f32 output tile


def _round_up(x, m):
    return -(-x // m) * m


def make_dist_emb(num_radial: int, cutoff: float = 5.0, envelope_exponent: int = 5):
    assert LANES % num_radial == 0, "packed layout needs num_radial to divide 128"
    # TODO(synk): for num_radial not dividing 128, fall back to a lane-padded layout.
    pack = LANES // num_radial  # edges packed per 128-lane output row

    # Envelope constants (match the PyTorch module exactly).
    p = envelope_exponent + 1
    a = -(p + 1) * (p + 2) / 2.0
    b = p * (p + 2)
    c = -p * (p + 1) / 2.0
    inv_cutoff = 1.0 / cutoff

    # Deterministic parameter init (reset_parameters): freq = [1..num_radial] * pi.
    freq = jnp.arange(1, num_radial + 1, dtype=jnp.float32) * math.pi
    # Lane-dense packed copy: lane l holds freq[l % num_radial].
    freq_packed = jnp.tile(freq, pack).reshape(1, LANES)

    # One-hot broadcast selector with 1/cutoff folded in:
    #   sel[g, l] = 1/cutoff  if l // num_radial == g  else 0
    # so one (T, pack) @ (pack, 128) MXU dot yields x = dist/cutoff already
    # broadcast to each edge's num_radial-lane group.
    lane = jnp.arange(LANES, dtype=jnp.int32)[None, :]
    grp = jnp.arange(pack, dtype=jnp.int32)[:, None]
    sel_scaled = jnp.where(lane // num_radial == grp, inv_cutoff, 0.0).astype(jnp.float32)

    def kernel(dist_ref, sel_ref, freq_ref, out_ref):
        # dist_ref: (T, pack)   f32 -- `pack` edges per packed row
        # sel_ref : (pack, 128) f32 -- constant one-hot selector * (1/cutoff)
        # freq_ref: (1, 128)    f32 -- freq tiled `pack` times along lanes
        # out_ref : (T, 128)    f32 -- edge g of a row occupies lanes [g*R, (g+1)*R)
        x = jnp.dot(
            dist_ref[...],
            sel_ref[...],
            preferred_element_type=jnp.float32,
            precision=jax.lax.Precision.HIGHEST,  # keep exact f32 multi-pass MXU path
        )
        # Envelope directly on the wide layout (narrow (T, pack) compute costs the
        # same number of vreg ops, so wide is free and needs no second matmul).
        x_pow_p0 = x ** (p - 1)
        poly = x_pow_p0 * (a + x * (b + c * x))  # a*x^(p-1) + b*x^p + c*x^(p+1)
        env = 1.0 / x + poly
        out_ref[...] = env * jnp.sin(freq_ref[...] * x)

    def forward(dist):
        # dist: (N,) -> (N, num_radial), f32
        n = dist.shape[0]
        dist = dist.astype(jnp.float32)

        # --- pick packed-row tiling ------------------------------------------
        n_groups = -(-n // pack)  # packed rows holding real edges
        if n_groups <= TILE_ROWS:
            steps = 1
            rows_per_tile = max(8, _round_up(n_groups, 8))  # sublane-aligned
        else:
            steps = -(-n_groups // TILE_ROWS)
            if steps % 2:  # even step count -> balanced across v7x's two TCs
                steps += 1
            rows_per_tile = _round_up(-(-n_groups // steps), 8)
        rows = steps * rows_per_tile
        n_pad = rows * pack

        if n_pad != n:
            # Pad with 1.0 (NOT 0.0): avoids 1/0 -> inf -> NaN in the cropped region.
            dist = jnp.concatenate(
                [dist, jnp.full((n_pad - n,), 1.0, dtype=jnp.float32)]
            )
        dist_packed = dist.reshape(rows, pack)

        out_packed = pl.pallas_call(
            kernel,
            out_shape=jax.ShapeDtypeStruct((rows, LANES), jnp.float32),
            grid_spec=pltpu.PrefetchScalarGridSpec(
                num_scalar_prefetch=0,
                grid=(steps,),
                in_specs=[
                    pl.BlockSpec((rows_per_tile, pack), lambda i: (i, 0)),
                    pl.BlockSpec((pack, LANES), lambda i: (0, 0)),   # constant
                    pl.BlockSpec((1, LANES), lambda i: (0, 0)),      # constant
                ],
                out_specs=pl.BlockSpec((rows_per_tile, LANES), lambda i: (i, 0)),
            ),
            compiler_params=pltpu.CompilerParams(
                # Shards the row-grid across v7x's two TensorCores; harmless elsewhere.
                dimension_semantics=("parallel",),
                # Covers I/O double buffers + elementwise temporaries; raises v5e's
                # 16 MiB default, stays within every generation's physical VMEM.
                vmem_limit_bytes=32 * 1024 * 1024,
            ),
        )(dist_packed, sel_scaled, freq_packed)

        # Row-major unpack: (rows, 128) is contiguously (rows*pack, num_radial).
        out = out_packed.reshape(n_pad, num_radial)
        if n_pad != n:
            # NOTE: this crop re-streams the output through HBM unless it fuses
            # into the caller; fusion-sensitive callers should consume the padded
            # buffer (or pad N to a multiple of 8*pack) inside the same jit.
            out = out[:n]
        return out

    return forward, freq


def reference_dist_emb(dist, freq, cutoff, envelope_exponent):
    # Pure-JAX reference mirroring the PyTorch forward exactly.
    p = envelope_exponent + 1
    a = -(p + 1) * (p + 2) / 2.0
    b = p * (p + 2)
    c = -p * (p + 1) / 2.0
    x = dist[:, None] / cutoff
    x_pow_p0 = x ** (p - 1)
    x_pow_p1 = x_pow_p0 * x
    x_pow_p2 = x_pow_p1 * x
    env = 1.0 / x + a * x_pow_p0 + b * x_pow_p1 + c * x_pow_p2
    return env * jnp.sin(freq[None, :] * x)


if __name__ == "__main__":
    num_radial = 16
    cutoff = 5.0
    envelope_exponent = 5

    fwd, freq = make_dist_emb(num_radial, cutoff, envelope_exponent)

    key = jax.random.PRNGKey(0)
    # n=64 hits the exact pack*8 multiple (no crop); n=300 exercises padding + crop.
    for n_edges in (64, 300):
        k = jax.random.fold_in(key, n_edges)
        dist = jax.random.uniform(
            k, (n_edges,), dtype=jnp.float32, minval=0.1, maxval=cutoff
        )
        out = jax.block_until_ready(fwd(dist))
        ref = reference_dist_emb(dist, freq, cutoff, envelope_exponent)
        assert out.shape == (n_edges, num_radial), out.shape
        # atol slightly relaxed for the mul-by-1/cutoff (vs divide) and Horner rewrite.
        assert jnp.allclose(out, ref, atol=1e-4, rtol=1e-5), (
            f"mismatch vs reference (N={n_edges})"
        )

    print("KERNEL_OK")
</pallas_src>

<mosaic_0001>
module attributes {stable_mosaic.version = 11 : i64} {
  func.func @kernel(%arg0: i32, %arg1: memref<8x8xf32, #tpu.memory_space<vmem>>, %arg2: memref<8x128xf32, #tpu.memory_space<vmem>>, %arg3: memref<1x128xf32, #tpu.memory_space<vmem>>, %arg4: memref<8x128xf32, #tpu.memory_space<vmem>>) attributes {dimension_semantics = [#tpu.dimension_semantics<parallel>], iteration_bounds = array<i64: 1>, scalar_prefetch = 0 : i64, scratch_operands = 0 : i64, tpu.core_type = #tpu.core_type<tc>, window_params = [{transform_indices = @transform_0, window_bounds = array<i64: 8, 8>}, {pipeline_mode = #tpu.pipeline_mode<synchronous>, transform_indices = @transform_1, window_bounds = array<i64: 8, 128>}, {pipeline_mode = #tpu.pipeline_mode<synchronous>, transform_indices = @transform_2, window_bounds = array<i64: 1, 128>}, {transform_indices = @transform_3, window_bounds = array<i64: 8, 128>}]} {
    %c0 = arith.constant 0 : index
    %c0_0 = arith.constant 0 : index
    %0 = vector.load %arg1[%c0, %c0_0] : memref<8x8xf32, #tpu.memory_space<vmem>>, vector<8x8xf32>
    %c0_1 = arith.constant 0 : index
    %c0_2 = arith.constant 0 : index
    %1 = vector.load %arg2[%c0_1, %c0_2] : memref<8x128xf32, #tpu.memory_space<vmem>>, vector<8x128xf32>
    %cst = arith.constant dense<0.000000e+00> : vector<8x128xf32>
    %2 = tpu.matmul %0, %1, %cst {dimension_numbers = #tpu.dot_dimension_numbers<[1], [0], [0], [1], [0, 0, 1, 1], [], []>, precision = #tpu.contract_precision<fp32>} : vector<8x8xf32>, vector<8x128xf32>, vector<8x128xf32> -> vector<8x128xf32>
    %3 = arith.mulf %2, %2 : vector<8x128xf32>
    %4 = arith.mulf %3, %3 : vector<8x128xf32>
    %5 = arith.mulf %2, %4 : vector<8x128xf32>
    %cst_3 = arith.constant -2.100000e+01 : f32
    %6 = vector.broadcast %cst_3 : f32 to vector<8x128xf32>
    %7 = arith.mulf %6, %2 : vector<8x128xf32>
    %cst_4 = arith.constant 4.800000e+01 : f32
    %8 = vector.broadcast %cst_4 : f32 to vector<8x128xf32>
    %9 = arith.addf %8, %7 : vector<8x128xf32>
    %10 = arith.mulf %2, %9 : vector<8x128xf32>
    %cst_5 = arith.constant -2.800000e+01 : f32
    %11 = vector.broadcast %cst_5 : f32 to vector<8x128xf32>
    %12 = arith.addf %11, %10 : vector<8x128xf32>
    %13 = arith.mulf %5, %12 : vector<8x128xf32>
    %cst_6 = arith.constant 1.000000e+00 : f32
    %14 = vector.broadcast %cst_6 : f32 to vector<8x128xf32>
    %15 = arith.divf %14, %2 : vector<8x128xf32>
    %16 = arith.addf %15, %13 : vector<8x128xf32>
    %c0_7 = arith.constant 0 : index
    %c0_8 = arith.constant 0 : index
    %17 = vector.load %arg3[%c0_7, %c0_8] : memref<1x128xf32, #tpu.memory_space<vmem>>, vector<1x128xf32>
    %18 = vector.broadcast %17 : vector<1x128xf32> to vector<8x128xf32>
    %19 = arith.mulf %18, %2 : vector<8x128xf32>
    %20 = math.sin %19 : vector<8x128xf32>
    %21 = arith.mulf %16, %20 : vector<8x128xf32>
    %c0_9 = arith.constant 0 : index
    %c0_10 = arith.constant 0 : index
    %22 = vector.load %arg4[%c0_9, %c0_10] : memref<8x128xf32, #tpu.memory_space<vmem>>, vector<8x128xf32>
    tpu.vector_store %arg4[%c0_9, %c0_10], %21 {strides = array<i32>} : memref<8x128xf32, #tpu.memory_space<vmem>>, vector<8x128xf32>,
    return
  }
  func.func @transform_0(%arg0: i32) -> (i32, i32) {
    %c0_i32 = arith.constant 0 : i32
    %c0_i32_0 = arith.constant 0 : i32
    return %arg0, %c0_i32 : i32, i32
  }
  func.func @transform_1(%arg0: i32) -> (i32, i32) {
    %c0_i32 = arith.constant 0 : i32
    %c0_i32_0 = arith.constant 0 : i32
    %c0_i32_1 = arith.constant 0 : i32
    return %c0_i32, %c0_i32_0 : i32, i32
  }
  func.func @transform_2(%arg0: i32) -> (i32, i32) {
    %c0_i32 = arith.constant 0 : i32
    %c0_i32_0 = arith.constant 0 : i32
    %c0_i32_1 = arith.constant 0 : i32
    return %c0_i32, %c0_i32_0 : i32, i32
  }
  func.func @transform_3(%arg0: i32) -> (i32, i32) {
    %c0_i32 = arith.constant 0 : i32
    %c0_i32_0 = arith.constant 0 : i32
    return %arg0, %c0_i32 : i32, i32
  }
}

</mosaic_0001>

<bundles_post_ra>
// kernel: tpu_custom_call.1
= control target key start
LH: loop header
LB: loop body
LE: loop exit
PB: predicated region body
PF: predicated region fallthrough
CT: control target
= control target key end

     0   :  { %8 = vsyncpa [#allocation3], 0  ;;  %s845_s0 = inlined_call_operand.hbm [shape: f32[8,8], index: 0, kind: input, shape index: {}]   ;;  %s846_s1 = inlined_call_operand.hbm [shape: f32[8,128], index: 1, kind: input, shape index: {}]   ;;  %s847_s2 = inlined_call_operand.vmem [shape: f32[1,128], index: 2, kind: input, shape index: {}]   ;;  %s848_s3 = inlined_call_operand.hbm [shape: f32[8,128], index: 3, kind: output, shape index: {}]  }
   0x1   :  { %9 = vsyncpa [#allocation6], 0 }
   0x2   :  { %10 = vsyncpa [#allocation4], 0  ;;  %s766_s12 = smov [#allocation2]   ;;  %s767_s14 = smov [#allocation5]  }
   0x3   :  { %s17_s13 = sshll.u32 %s766_s12, 4  ;;  %s27_s15 = sshll.u32 %s767_s14, 4  ;;  %s18_s13 = int_to_ptr.vmem [resolvable:$true] %s17_s13  ;;  %s28_s15 = int_to_ptr.vmem [resolvable:$true] %s27_s15 }
   0x4   :  { %s708_s16 = scalar_lea.vmem %s18_s13, 128  ;;  %p713_p1 = scmp.lt.s32.totalorder %s18_s13, %s18_s13 }
   0x5   :  { %p709_p0 = scmp.ne.s32.totalorder %s18_s13, %s708_s16  ;;  %p714_p2 = scmp.lt.s32.totalorder %s708_s16, %s708_s16 }
   0x7   :  { %p715_p3 = por %p714_p2, %p713_p1 }
   0x9   :  { %p716_p4 = pnand %p715_p3, %p709_p0 }
   0xb   :  { %719 = shalt.err (!%p716_p4)
}
   0xc   :  { %20 = dma.hbm_to_vmem [thread:$0]  %s845_s0, 128, %s18_s13, [#allocation3]  }
   0xd   :  { %s728_s19 = scalar_lea.vmem %s28_s15, 128  ;;  %p733_p6 = scmp.lt.s32.totalorder %s28_s15, %s28_s15 }
   0xe   :  { %p729_p5 = scmp.ne.s32.totalorder %s28_s15, %s728_s19  ;;  %p734_p7 = scmp.lt.s32.totalorder %s728_s19, %s728_s19 }
  0x10   :  { %p735_p8 = por %p734_p7, %p733_p6 }
  0x12   :  { %p736_p9 = pnand %p735_p8, %p729_p5 }
  0x14   :  { %739 = shalt.err (!%p736_p9)
}
  0x15   :  { %30 = dma.hbm_to_vmem [thread:$0]  %s846_s1, 128, %s28_s15, [#allocation6]  }
  0x16   :  { %760 = dma.done.wait [#allocation3], 128  }
  0x17   :  { %761 = vsyncadd [#allocation3], 4294967168 }
  0x18   :  { %762 = dma.done.wait [#allocation6], 128  }
  0x19   :  { %763 = vsyncadd [#allocation6], 4294967168  ;;  %v768_v0 = vmov 0.0   ;;  %vm769_vm0 = vmmov 0   ;;  %vm41_vm1 = vcmask 64512   ;;  %v40_v1 = vld [vmem:[#allocation5] sm:$0xff] }
  0x1a   :  { %649 = vmatprep.subr.mxu0 %v768_v0  ;;  %654 = vmatprep.subr.mxu1 %v768_v0  ;;  %v39_v2 = vld [vmem:[#allocation2] sm:$0xff]  ;;  %v76_v3 = vand.u32 4294901760, %v40_v1  ;;  %v770_v43 = vmov 683565275   ;;  %v771_v45 = vmov 2475754826  }
  0x1b   :  { %651 = vmatprep.mubr.msk.f32.mxu0 %vm769_vm0, %v768_v0  ;;  %656 = vmatprep.mubr.msk.f32.mxu1 %vm769_vm0, %v768_v0  ;;  %v43_v4 = vsel %vm41_vm1, %v39_v2, 0  ;;  %v632_v30 = vld [vmem:[%s847_s2] ss:$0 sm:$0xff]  ;;  %v772_v48 = vmov 2131351028   ;;  %s776_s2 = smov [#allocation7]  }
  0x1c   :  { %v111_v5 = vand.u32 4294901760, %v43_v4  ;;  %650 = vmatpush3.msra.mxu0 %v76_v3  ;;  %v153_v6 = vsub.f32 %v40_v1, %v76_v3  ;;  %v773_v51 = vmov 2102212464   ;;  %v774_v54 = vmov 920167782   ;;  %s622_s22 = sshll.u32 %s776_s2, 4  ;;  %s623_s22 = int_to_ptr.vmem [resolvable:$true] %s622_s22 }
  0x1d   :  { %659 = vmatprep.subr.mxu0 %v768_v0  ;;  %v775_v57 = vmov 1326507024   ;;  %s740_s23 = scalar_lea.vmem %s623_s22, 128  ;;  %p745_p11 = scmp.lt.s32.totalorder %s623_s22, %s623_s22 }
  0x1e   :  { %v112_v7 = vsub.f32 %v43_v4, %v111_v5  ;;  %v154_v8 = vand.u32 4294901760, %v153_v6  ;;  %p741_p10 = scmp.ne.s32.totalorder %s623_s22, %s740_s23  ;;  %p746_p12 = scmp.lt.s32.totalorder %s740_s23, %s740_s23 }
  0x20   :  { %v113_v9 = vand.u32 4294901760, %v112_v7  ;;  %v155_v10 = vsub.f32 %v153_v6, %v154_v8  ;;  %p747_p13 = por %p746_p12, %p745_p11 }
  0x22   :  { %v114_v11 = vsub.f32 %v112_v7, %v113_v9  ;;  %v156_v12 = vand.u32 4294901760, %v155_v10  ;;  %p748_p0 = pnand %p747_p13, %p741_p10 }
  0x24   :  { %v115_v13 = vand.u32 4294901760, %v114_v11  ;;  %655 = vmatpush3.msra.mxu1 %v156_v12 }
  0x25   :  { %657 = vmatmul.mubr.f32.vlgmr.msra.gmra.mxu1 %v111_v5  ;;  %664 = vmatprep.subr.mxu1 %v768_v0 }
  0x26   :  { %652 = vmatmul.mubr.f32.vlgmr.msra.gmra.mxu0 %v115_v13  ;;  %665 = vmatpush3.msra.mxu1 %v76_v3 }
  0x27   :  { %660 = vmatpush3.msra.mxu0 %v153_v6  ;;  %661 = vmatprep.mubr.msk.f32.mxu0 %vm769_vm0, %v768_v0 }
  0x28   :  { %666 = vmatprep.mubr.msk.f32.mxu1 %vm769_vm0, %v768_v0  ;;  %669 = vmatprep.subr.mxu0 %v768_v0 }
  0x29   :  { %667 = vmatmul.mubr.f32.vlgmr.msra.gmra.mxu1 %v113_v9  ;;  %674 = vmatprep.subr.mxu1 %v768_v0 }
  0x2a   :  { %662 = vmatmul.mubr.f32.vlgmr.msra.gmra.mxu0 %v112_v7  ;;  %675 = vmatpush3.msra.mxu1 %v76_v3 }
  0x2b   :  { %670 = vmatpush3.msra.mxu0 %v154_v8  ;;  %671 = vmatprep.mubr.msk.f32.mxu0 %vm769_vm0, %v768_v0 }
  0x2c   :  { %676 = vmatprep.mubr.msk.f32.mxu1 %vm769_vm0, %v768_v0 }
  0x2d   :  { %677 = vmatmul.mubr.f32.vlgmr.msra.gmra.mxu1 %v111_v5 }
  0x2e   :  { %672 = vmatmul.mubr.f32.vlgmr.msra.gmra.mxu0 %v111_v5 }
  0xe5   :  { %v193_v15 = vpop.f32.mrf.mxu1 }
  0xe6   :  { %v117_v14 = vpop.f32.mrf.mxu0 }
  0xe7   :  { %v658_v17 = vpop.f32.mrf.mxu1  ;;  %v194_v18 = vadd.f32 %v193_v15, %v117_v14 }
  0xe8   :  { %v653_v16 = vpop.f32.mrf.mxu0 }
  0xe9   :  { %v341_v20 = vpop.f32.mrf.mxu1 }
  0xea   :  { %v267_v19 = vpop.f32.mrf.mxu0 }
  0xeb   :  { %v268_v21 = vadd.f32 %v267_v19, %v194_v18  ;;  %v668_v23 = vpop.f32.mrf.mxu1 }
  0xec   :  { %v663_v22 = vpop.f32.mrf.mxu0 }
  0xed   :  { %v342_v24 = vadd.f32 %v341_v20, %v268_v21  ;;  %v487_v26 = vpop.f32.mrf.mxu1 }
  0xee   :  { %v415_v25 = vpop.f32.mrf.mxu0 }
  0xef   :  { %v416_v27 = vadd.f32 %v415_v25, %v342_v24  ;;  %v678_v29 = vpop.f32.mrf.mxu1 }
  0xf0   :  { %v673_v28 = vpop.f32.mrf.mxu0 }
  0xf1   :  { %v812_v31 = vadd.f32 %v487_v26, %v416_v27 }
  0xf3   :  { %v815_v32 = vmul.f32 %v632_v30, %v812_v31 }
  0xf5   :  { %v513_v33 = vand.u32 2139095040, %v815_v32  ;;  %v510_v37 = vand.u32 2147483647, %v815_v32  ;;  %vm512_vm9 = vcmp.lt.s32.totalorder %v815_v32, 0  ;;  %vm602_vm14 = vweird.f32 %v815_v32 }
  0xf7   :  { %v514_v34 = vshrl.u32 %v513_v33, 23  ;;  %v517_v40 = vand.u32 8388607, %v510_v37  ;;  %vm511_vm10 = vcmp.le.f32.partialorder %v510_v37, 0.7853982 }
  0xf9   :  { %v633_v35 = vadd.s32 4294967169, %v514_v34  ;;  %v518_v59 = vor.u32 8388608, %v517_v40 }
  0xfb   :  { %v520_v36 = vadd.s32 1, %v633_v35  ;;  %v558_v9 = vshll.u32 %v518_v59, 8 }
  0xfd   :  { %vm521_vm2 = vcmp.gt.s32.totalorder %v520_v36, 0 }
  0xfe   :  { %v522_v38 = vsel %vm521_vm2, %v520_v36, 0 }
  0xff   :  { %v524_v39 = vand.u32 31, %v522_v38  ;;  %v523_v42 = vshrl.u32 %v522_v38, 5 }
 0x101   :  { %v525_v41 = vsub.s32 32, %v524_v39  ;;  %v527_v44 = vshll.u32 %v770_v43, %v524_v39  ;;  %v530_v46 = vshll.u32 %v771_v45, %v524_v39  ;;  %v533_v50 = vshll.u32 %v772_v48, %v524_v39 }
 0x102   :  { %v536_v53 = vshll.u32 %v773_v51, %v524_v39  ;;  %v539_v56 = vshll.u32 %v774_v54, %v524_v39  ;;  %vm542_vm3 = vcmp.lt.s32.totalorder %v523_v42, 1  ;;  %vm545_vm4 = vcmp.lt.s32.totalorder %v523_v42, 4 }
 0x103   :  { %v528_v47 = vshrl.u32 %v771_v45, %v525_v41  ;;  %v531_v49 = vshrl.u32 %v772_v48, %v525_v41  ;;  %v534_v52 = vshrl.u32 %v773_v51, %v525_v41  ;;  %v537_v55 = vshrl.u32 %v774_v54, %v525_v41 }
 0x104   :  { %v540_v58 = vshrl.u32 %v775_v57, %v525_v41  ;;  %v526_v4 = vshrl.u32 %v770_v43, %v525_v41  ;;  %vm544_vm5 = vcmp.lt.s32.totalorder %v523_v42, 3  ;;  %vm543_vm6 = vcmp.lt.s32.totalorder %v523_v42, 2 }
 0x105   :  { %v529_v60 = vor.u32 %v528_v47, %v527_v44  ;;  %v532_v61 = vor.u32 %v531_v49, %v530_v46  ;;  %v535_v62 = vor.u32 %v534_v52, %v533_v50  ;;  %v538_v63 = vor.u32 %v537_v55, %v536_v53 }
 0x106   :  { %v541_v0 = vor.u32 %v540_v58, %v539_v56  ;;  %v494_v51 = vmul.f32 -21.0, %v812_v31  ;;  %v491_v55 = vmul.f32 %v812_v31, %v812_v31 }
 0x107   :  { %v547_v1 = vsel %vm545_vm4, %v535_v62, 2102212464  ;;  %v550_v2 = vsel %vm542_vm3, %v529_v60, %v532_v61  ;;  %v554_v3 = vsel %vm542_vm3, %v532_v61, %v535_v62  ;;  %v551_v5 = vsel %vm545_vm4, %v538_v63, 920167782 }
 0x108   :  { %v555_v6 = vsel %vm545_vm4, %v541_v0, 1326507024  ;;  %v552_v7 = vsel %vm544_vm5, %v535_v62, %v551_v5  ;;  %v546_v10 = vsel %vm542_vm3, %v526_v4, %v529_v60  ;;  %v548_v11 = vsel %vm544_vm5, %v532_v61, %v547_v1 }
 0x109   :  { %v556_v8 = vsel %vm544_vm5, %v538_v63, %v555_v6  ;;  %v553_v12 = vsel %vm543_vm6, %v550_v2, %v552_v7  ;;  %v549_v18 = vsel %vm543_vm6, %v546_v10, %v548_v11  ;;  %v495_v53 = vadd.f32 48.0, %v494_v51 }
 0x10a   :  { %v557_v13 = vsel %vm543_vm6, %v554_v3, %v556_v8  ;;  %v824_v16 = vmul.u32.u64.low %v558_v9, %v553_v12  ;;  %v825_v17 = vmul.u32.u64.high %v558_v9, %v553_v12, %v824_v16  ;;  %v565_v20 = vmul.u32 %v558_v9, %v549_v18 }
 0x10b   :  { %v821_v14 = vmul.u32.u64.low %v558_v9, %v557_v13  ;;  %v822_v15 = vmul.u32.u64.high %v558_v9, %v557_v13, %v821_v14  ;;  %v496_v57 = vmul.f32 %v495_v53, %v812_v31  ;;  %v492_v58 = vmul.f32 %v491_v55, %v491_v55 }
 0x10c   :  { %v568_v19 = vadd.s32 1, %v825_v17 }
 0x10d   :  { %vm567_vm7 = vc.u32 %v822_v15, %v824_v16  ;;  %v566_v34 = vadd.s32 %v824_v16, %v822_v15  ;;  %v497_v59 = vadd.f32 -28.0, %v496_v57  ;;  %v493_v62 = vmul.f32 %v492_v58, %v812_v31 }
 0x10e   :  { %v569_v21 = vsel %vm567_vm7, %v568_v19, %v825_v17 }
 0x10f   :  { %v570_v22 = vadd.s32 %v569_v21, %v565_v20  ;;  %v498_v2 = vmul.f32 %v497_v59, %v493_v62 }
 0x111   :  { %v571_v23 = vadd.s32 536870912, %v570_v22 }
 0x113   :  { %v572_v24 = vshrl.u32 %v571_v23, 30 }
 0x115   :  { %v573_v25 = vshll.u32 %v572_v24, 30  ;;  %v596_v48 = vsub.s32 4, %v572_v24 }
 0x117   :  { %v574_v26 = vsub.s32 %v570_v22, %v573_v25  ;;  %v597_v52 = vsel %vm512_vm9, %v596_v48, %v572_v24 }
 0x118   :  { %v599_v54 = vsel %vm511_vm10, 0, %v597_v52 }
 0x119   :  { %v576_v27 = vsub.s32 0, %v574_v26  ;;  %v603_v56 = vadd.s32 3, %v599_v54 }
 0x11b   :  { %v634_v28 = vmin.u32 %v576_v27, %v574_v26  ;;  %v604_v37 = vand.u32 3, %v603_v56 }
 0x11d   :  { %v578_v29 = vclz %v634_v28  ;;  %vm609_vm11 = vcmp.eq.s32.totalorder %v604_v37, 2  ;;  %vm606_vm12 = vcmp.eq.s32.totalorder %v604_v37, 0  ;;  %vm605_vm13 = vcmp.lt.s32.totalorder %v604_v37, 2 }
 0x11f   :  { %v635_v30 = vadd.s32 4294967294, %v578_v29 }
 0x121   :  { %vm636_vm8 = vcmp.lt.s32.totalorder %v635_v30, 0 }
 0x122   :  { %v581_v33 = vsel %vm636_vm8, 0, %v635_v30 }
 0x123   :  { %v582_v35 = vsub.s32 32, %v581_v33  ;;  %v586_v36 = vsub.s32 4294967266, %v581_v33  ;;  %v583_v38 = vshll.u32 %v574_v26, %v581_v33 }
 0x125   :  { %v584_v39 = vshrl.u32 %v566_v34, %v582_v35  ;;  %v587_v40 = vadd.s32 127, %v586_v36 }
 0x127   :  { %v585_v41 = vor.u32 %v584_v39, %v583_v38  ;;  %v588_v42 = vshll.u32 %v587_v40, 23 }
 0x129   :  { %v589_v43 = vor.u32 4788187, %v588_v42  ;;  %v592_v45 = vcvt.s32.f32 %v585_v41 }
 0x12b   :  { %v590_v44 = vand.u32 2147483647, %v589_v43 }
 0x12d   :  { %v593_v46 = vmul.f32 %v592_v45, %v590_v44 }
 0x12f   :  { %v594_v47 = vxor.u32 2147483648, %v593_v46 }
 0x131   :  { %v595_v49 = vsel %vm512_vm9, %v594_v47, %v593_v46 }
 0x132   :  { %v598_v50 = vsel %vm511_vm10, %v815_v32, %v595_v49 }
 0x133   :  { %694 = vcosq.f32 %v598_v50 }
 0x134   :  { %696 = vsinq.f32 %v598_v50 }
 0x135   :  { %698 = vrcp.f32 %v812_v31 }
 0x140   :  { %v695_v60 = vpop.eup %694 }
 0x141   :  { %v697_v61 = vpop.eup %696  ;;  %v610_v63 = vxor.u32 2147483648, %v695_v60 }
 0x142   :  { %v699_v0 = vpop.eup %698  ;;  %v607_v1 = vxor.u32 2147483648, %v697_v61 }
 0x143   :  { %v611_v3 = vsel %vm609_vm11, %v610_v63, %v697_v61  ;;  %v501_v5 = vadd.f32 %v699_v0, %v498_v2 }
 0x144   :  { %v608_v4 = vsel %vm606_vm12, %v695_v60, %v607_v1 }
 0x145   :  { %v612_v6 = vsel %vm605_vm13, %v608_v4, %v611_v3 }
 0x146   :  { %v613_v7 = vsel %vm602_vm14, nan, %v612_v6 }
 0x147   :  { %v614_v8 = vmul.f32 %v613_v7, %v501_v5 }
 0x149   :  { %615 = vst [vmem:[#allocation7] sm:$0xff] %v614_v8 }
 0x14a   :  { %751 = shalt.err (!%p748_p0)
}
 0x14b   :  { %625 = dma.vmem_to_hbm [thread:$0]  %s623_s22, 128, %s848_s3, [#allocation4]  }
 0x14c   :  { %764 = dma.done.wait [#allocation4], 128  }
 0x14d   :  { %765 = vsyncadd [#allocation4], 4294967168 }
 0x14e   :  { %629 = vsyncpa [#allocation3], 1 }
 0x14f   :  { %630 = vsyncpa [#allocation6], 1 }
 0x150   :  { %631 = vsyncpa [#allocation4], 1 }

</bundles_post_ra>
